<compile_context>
chip_gen: v6e
topology: v6e:2x2x1
jax: 0.10.0
libtpu: 0.0.40
codegen_flags: <defaults>
</compile_context>

<pallas_src>
import numpy as np
import jax
import jax.numpy as jnp
from jax.experimental import pallas as pl
from jax.experimental.pallas import tpu as pltpu

# ----- model_args (small, deterministic) -----
NUM_USERS = 12
NUM_ITEMS = 50
L = 5          # args.L  : max sequence length
D = 32         # args.d  : latent dimension
NH = 16        # args.nh : horizontal filters per height
NV = 4         # args.nv : vertical filters
B = 2          # real batch size
T = 6          # number of target items per example (item_var width)

BP = 16                     # batch padded to the bf16 sublane tile (16)
FC1_DIM_V = NV * D          # 128
FC1_DIM_H = NH * L          # 80
FC1_DIM_IN = FC1_DIM_V + FC1_DIM_H   # 208
LD = L * D                  # 160
TD = T * D                  # 192

# Big-matmul weight slab layout (lane axis, multiples of 128):
POOL_W = 128                # per-window-position column group (L*NH = 80 real)
COL_AV = L * POOL_W         # 640 : folded conv_v->fc1_v block, replicated 4x
WC_W = COL_AV + POOL_W      # 768 : slab lane width (no dead FCH group)
BIAS_ROW = LD               # 160 : ones-lane row carrying all pre-act biases
KP = 176                    # K padded to a bf16 sublane multiple (160 data + bias + pad)

# Small constant slab (ws): group-sum matrix R + fc1 horizontal weight.
WS_RCOL = 0                 # cols   0:128 : R, R[t*D+d, t] = 1
WS_FCH = 128                # cols 128:256 : fc1_h weight (rows 0:80), replicated 4x
WS_W = 256

# Per-call f32 data slab (df) layout:
XREP_W = 256                # replicated-x lane width (ceil(T*D/128)*128)
DF_U = 2 * XREP_W           # 512 : user embedding replicated 8x
DF_B2 = 3 * XREP_W          # 768 : b2(item) in lanes 0:T
DF_W = DF_B2 + 128          # 896


# -------------------- Pallas kernel --------------------
def caser_kernel(wc_ref, ws_ref, ef_ref, df_ref, out_ref):
    # (1) ONE fused MXU matmul: every (window, height) horizontal conv AND the
    #     (purely linear) vertical conv folded through fc1's vertical block
    #     (replicated 4x across its 128-lane group).  All biases ride the
    #     ones-lane (ef col 160 == 1.0, wc row 160 == bias row).
    m = jnp.dot(ef_ref[...], wc_ref[...],
                preferred_element_type=jnp.float32)                       # [BP, 768] f32

    # (2) ReLU + max_pool1d over window positions: 5 aligned 128-lane groups.
    #     Invalid (window, height) columns and pad lanes are exact zeros with
    #     zero bias, and pooling happens after ReLU (>= 0), so they never win.
    pooled = jnp.maximum(m[:, 0:POOL_W], 0.0)
    for t in range(1, L):
        pooled = jnp.maximum(pooled,
                             jnp.maximum(m[:, t * POOL_W:(t + 1) * POOL_W], 0.0))
    # pooled lanes 0:80 == torch.cat(out_hs, 1); lanes 80:128 are exact zeros.

    # (3) fc1 (dropout = identity, eval path).  The fc1 horizontal weight in ws
    #     is replicated 4x across 32-lane groups, and the av block of m already
    #     contains (conv_v -> fc1_v + biases) replicated 4x, so z comes out
    #     replicated 4x with zero lane shuffles.
    zh = jnp.dot(pooled.astype(jnp.bfloat16),
                 ws_ref[0:POOL_W, WS_FCH:WS_FCH + POOL_W],
                 preferred_element_type=jnp.float32)                      # [BP, 128]
    z4 = jnp.maximum(m[:, COL_AV:COL_AV + POOL_W] + zh, 0.0)              # [BP, 128] = z x4

    # (4) Epilogue, all 2-D lane-major (no 3-D intermediates, no cross-sublane
    #     shuffles):  logits[b,t] = W2[item[b,t]] . cat([z,u])[b] + b2[b,t].
    z_rep = jnp.concatenate([z4, z4], axis=-1)                            # [BP, 256] = z x8
    u_rep = df_ref[:, DF_U:DF_U + XREP_W]                                 # [BP, 256] = u x8
    psum = z_rep * df_ref[:, 0:XREP_W] + u_rep * df_ref[:, XREP_W:2 * XREP_W]
    # per-target group sum via one tiny MXU matmul against the 0/1 matrix R
    logits = jnp.dot(psum.astype(jnp.bfloat16), ws_ref[:, WS_RCOL:WS_RCOL + 128],
                     preferred_element_type=jnp.float32) \
             + df_ref[:, DF_B2:DF_B2 + 128]                               # [BP, 128]
    out_ref[...] = jax.nn.sigmoid(logits)                                 # lane-dense store


def caser_forward_pallas(wc, ws, ef, df):
    pred = pl.pallas_call(
        caser_kernel,
        out_shape=jax.ShapeDtypeStruct((BP, 128), jnp.float32),
        in_specs=[pl.BlockSpec(memory_space=pltpu.MemorySpace.VMEM) for _ in range(4)],
        out_specs=pl.BlockSpec(memory_space=pltpu.MemorySpace.VMEM),
    )(wc, ws, ef, df)
    return pred[:B, :T]


# -------------------- parameter init (deterministic) --------------------
def init_params(key):
    ks = jax.random.split(key, 12)
    p = {}
    p["user_emb"] = jax.random.normal(ks[0], (NUM_USERS, D), jnp.float32) * (1.0 / D)
    p["item_emb"] = jax.random.normal(ks[1], (NUM_ITEMS, D), jnp.float32) * (1.0 / D)
    p["W2"] = jax.random.normal(ks[2], (NUM_ITEMS, 2 * D), jnp.float32) * (1.0 / (2 * D))
    p["b2"] = jnp.zeros((NUM_ITEMS, 1), jnp.float32)
    p["wv"] = jax.random.normal(ks[3], (NV, L), jnp.float32) * 0.1      # conv_v (nv,1,L,1) squeezed
    p["bv"] = jax.random.normal(ks[4], (NV,), jnp.float32) * 0.1
    conv_h_w, conv_h_b = [], []
    for hidx in range(L):
        h = hidx + 1
        conv_h_w.append(jax.random.normal(jax.random.fold_in(ks[5], hidx), (NH, h, D), jnp.float32) * 0.1)
        conv_h_b.append(jax.random.normal(jax.random.fold_in(ks[6], hidx), (NH,), jnp.float32) * 0.1)
    p["conv_h_w"] = conv_h_w
    p["conv_h_b"] = conv_h_b
    p["fc1_w"] = jax.random.normal(ks[7], (D, FC1_DIM_IN), jnp.float32) * 0.1   # Linear(fc1_dim_in, d).weight
    p["fc1_b"] = jax.random.normal(ks[8], (D,), jnp.float32) * 0.1
    return p


# -------------------- constant-weight packing (done once) --------------------
def pack_constant_weights(p):
    fc1_w = np.asarray(p["fc1_w"], np.float32)        # [D, 208]
    fc1_b = np.asarray(p["fc1_b"], np.float32)        # [D]
    wv = np.asarray(p["wv"], np.float32)              # [NV, L]
    bv = np.asarray(p["bv"], np.float32)              # [NV]
    W1_v = fc1_w[:, :FC1_DIM_V].reshape(D, NV, D)     # [k, v, d]
    W1_h = fc1_w[:, FC1_DIM_V:]                       # [D, 80]

    wc = np.zeros((KP, WC_W), np.float32)

    # Block-structured horizontal-conv weights: window-major 128-lane groups.
    # Column (t*128 + hidx*NH + n) = conv of height hidx+1, filter n, window t.
    # Biases go on the ones-lane row; invalid (t, h) pairs stay all-zero.
    for hidx in range(L):
        h = hidx + 1
        W = np.asarray(p["conv_h_w"][hidx], np.float32).reshape(NH, h * D)   # [NH, h*D]
        bvec = np.asarray(p["conv_h_b"][hidx], np.float32)                   # [NH]
        for t in range(L - h + 1):
            c0 = t * POOL_W + hidx * NH
            wc[t * D:(t + h) * D, c0:c0 + NH] = W.T
            wc[BIAS_ROW, c0:c0 + NH] = bvec

    # Vertical conv (linear, no activation) folded exactly through fc1's
    # vertical block, plus conv_v bias and fc1 bias, replicated 4x.
    av = np.einsum("vl,kvd->ldk", wv, W1_v).reshape(LD, D)
    av_b = np.einsum("v,kvd->k", bv, W1_v) + fc1_b
    for g in range(POOL_W // D):
        wc[0:LD, COL_AV + g * D:COL_AV + (g + 1) * D] = av
        wc[BIAS_ROW, COL_AV + g * D:COL_AV + (g + 1) * D] = av_b

    # Small slab: group-sum reduction matrix R (cols 0:128) and fc1 horizontal
    # weight replicated 4x (cols 128:256, rows 0:80).
    ws = np.zeros((XREP_W, WS_W), np.float32)
    rows = np.arange(TD)
    ws[rows, WS_RCOL + rows // D] = 1.0
    for g in range(POOL_W // D):
        ws[0:FC1_DIM_H, WS_FCH + g * D:WS_FCH + (g + 1) * D] = W1_h.T

    return jnp.asarray(wc, jnp.bfloat16), jnp.asarray(ws, jnp.bfloat16)


# -------------------- per-call data packing (gathers stay in plain JAX) --------------------
def prepare_data_inputs(p, user_var, seq_var, item_var):
    # Embedding-table gathers are pure indexing; layout plumbing only below.
    E = p["item_emb"][seq_var].reshape(B, LD)                  # [B, L*D]
    ef = jnp.zeros((BP, KP), jnp.bfloat16)
    ef = ef.at[:B, :LD].set(E.astype(jnp.bfloat16))
    ef = ef.at[:, BIAS_ROW].set(1.0)                           # ones-lane -> bias row

    u = p["user_emb"][user_var]                                # [B, D]
    W2g = p["W2"][item_var]                                    # [B, T, 2D]
    b2 = p["b2"][item_var][:, :, 0]                            # [B, T]

    df = jnp.zeros((BP, DF_W), jnp.float32)
    df = df.at[:B, 0:TD].set(W2g[:, :, :D].reshape(B, TD))                  # w2 z-part, t-major
    df = df.at[:B, XREP_W:XREP_W + TD].set(W2g[:, :, D:].reshape(B, TD))    # w2 u-part, t-major
    df = df.at[:B, DF_U:DF_U + XREP_W].set(jnp.tile(u, (1, XREP_W // D)))   # u replicated x8
    df = df.at[:B, DF_B2:DF_B2 + T].set(b2)
    return ef, df


# -------------------- pure-JAX reference (faithful, unfolded, f32) --------------------
def caser_forward_ref(p, user_var, seq_var, item_var):
    E = p["item_emb"][seq_var]                        # [B, L, D]
    u = p["user_emb"][user_var]
    out_v = jnp.einsum("vl,bld->bvd", p["wv"], E) + p["bv"][None, :, None]
    out_v = out_v.reshape(B, FC1_DIM_V)
    out_hs = []
    for hidx in range(L):
        h = hidx + 1
        W = p["conv_h_w"][hidx]
        cs = [jnp.einsum("bid,nid->bn", E[:, t:t + h, :], W) + p["conv_h_b"][hidx][None, :]
              for t in range(L - h + 1)]
        c = jax.nn.relu(jnp.stack(cs, axis=2))        # [B, NH, L-h+1]
        out_hs.append(c.max(axis=2))
    out_h = jnp.concatenate(out_hs, axis=1)
    out = jnp.concatenate([out_v, out_h], axis=1)
    z = jax.nn.relu(out @ p["fc1_w"].T + p["fc1_b"])
    x = jnp.concatenate([z, u], axis=1)               # [B, 2D]
    w2 = p["W2"][item_var]
    b2 = p["b2"][item_var][:, :, 0]
    return jax.nn.sigmoid(jnp.einsum("btd,bd->bt", w2, x) + b2)


if __name__ == "__main__":
    key = jax.random.PRNGKey(0)
    kp, ku, ks, ki = jax.random.split(key, 4)
    params = init_params(kp)

    user_var = jax.random.randint(ku, (B,), 0, NUM_USERS, jnp.int32)
    seq_var = jax.random.randint(ks, (B, L), 0, NUM_ITEMS, jnp.int32)
    item_var = jax.random.randint(ki, (B, T), 0, NUM_ITEMS, jnp.int32)

    wc, ws = pack_constant_weights(params)                       # constants (pack once)
    ef, df = prepare_data_inputs(params, user_var, seq_var, item_var)

    pred = caser_forward_pallas(wc, ws, ef, df)
    pred = jax.block_until_ready(pred)

    ref = jax.block_until_ready(caser_forward_ref(params, user_var, seq_var, item_var))
    # bf16 matmul operands / biases (f32 accumulation) -> relaxed tolerance vs f32 ref.
    np.testing.assert_allclose(np.asarray(pred), np.asarray(ref), rtol=2e-2, atol=2e-3)

    print("KERNEL_OK")
</pallas_src>

<mosaic_0001>
module attributes {stable_mosaic.version = 11 : i64} {
  func.func @caser_kernel(%arg0: memref<176x768xbf16, #tpu.memory_space<vmem>>, %arg1: memref<256x256xbf16, #tpu.memory_space<vmem>>, %arg2: memref<16x176xbf16, #tpu.memory_space<vmem>>, %arg3: memref<16x896xf32, #tpu.memory_space<vmem>>, %arg4: memref<16x128xf32, #tpu.memory_space<vmem>>) attributes {dimension_semantics = [], scalar_prefetch = 0 : i64, scratch_operands = 0 : i64, tpu.core_type = #tpu.core_type<tc>} {
    %c0 = arith.constant 0 : index
    %c0_0 = arith.constant 0 : index
    %0 = vector.load %arg2[%c0, %c0_0] : memref<16x176xbf16, #tpu.memory_space<vmem>>, vector<16x176xbf16>
    %c0_1 = arith.constant 0 : index
    %c0_2 = arith.constant 0 : index
    %1 = vector.load %arg0[%c0_1, %c0_2] : memref<176x768xbf16, #tpu.memory_space<vmem>>, vector<176x768xbf16>
    %cst = arith.constant dense<0.000000e+00> : vector<16x768xf32>
    %2 = tpu.matmul %0, %1, %cst {dimension_numbers = #tpu.dot_dimension_numbers<[1], [0], [0], [1], [0, 0, 1, 1], [], []>} : vector<16x176xbf16>, vector<176x768xbf16>, vector<16x768xf32> -> vector<16x768xf32>
    %3 = vector.extract_strided_slice %2 {offsets = [0, 0], sizes = [16, 128], strides = [1, 1]} : vector<16x768xf32> to vector<16x128xf32>
    %cst_3 = arith.constant 0.000000e+00 : f32
    %4 = vector.broadcast %cst_3 : f32 to vector<16x128xf32>
    %5 = arith.maximumf %3, %4 : vector<16x128xf32>
    %6 = vector.extract_strided_slice %2 {offsets = [0, 128], sizes = [16, 128], strides = [1, 1]} : vector<16x768xf32> to vector<16x128xf32>
    %cst_4 = arith.constant 0.000000e+00 : f32
    %7 = vector.broadcast %cst_4 : f32 to vector<16x128xf32>
    %8 = arith.maximumf %6, %7 : vector<16x128xf32>
    %9 = arith.maximumf %5, %8 : vector<16x128xf32>
    %10 = vector.extract_strided_slice %2 {offsets = [0, 256], sizes = [16, 128], strides = [1, 1]} : vector<16x768xf32> to vector<16x128xf32>
    %cst_5 = arith.constant 0.000000e+00 : f32
    %11 = vector.broadcast %cst_5 : f32 to vector<16x128xf32>
    %12 = arith.maximumf %10, %11 : vector<16x128xf32>
    %13 = arith.maximumf %9, %12 : vector<16x128xf32>
    %14 = vector.extract_strided_slice %2 {offsets = [0, 384], sizes = [16, 128], strides = [1, 1]} : vector<16x768xf32> to vector<16x128xf32>
    %cst_6 = arith.constant 0.000000e+00 : f32
    %15 = vector.broadcast %cst_6 : f32 to vector<16x128xf32>
    %16 = arith.maximumf %14, %15 : vector<16x128xf32>
    %17 = arith.maximumf %13, %16 : vector<16x128xf32>
    %18 = vector.extract_strided_slice %2 {offsets = [0, 512], sizes = [16, 128], strides = [1, 1]} : vector<16x768xf32> to vector<16x128xf32>
    %cst_7 = arith.constant 0.000000e+00 : f32
    %19 = vector.broadcast %cst_7 : f32 to vector<16x128xf32>
    %20 = arith.maximumf %18, %19 : vector<16x128xf32>
    %21 = arith.maximumf %17, %20 : vector<16x128xf32>
    %22 = arith.truncf %21 : vector<16x128xf32> to vector<16x128xbf16>
    %c0_8 = arith.constant 0 : index
    %c128 = arith.constant 128 : index
    %23 = vector.load %arg1[%c0_8, %c128] : memref<256x256xbf16, #tpu.memory_space<vmem>>, vector<128x128xbf16>
    %cst_9 = arith.constant dense<0.000000e+00> : vector<16x128xf32>
    %24 = tpu.matmul %22, %23, %cst_9 {dimension_numbers = #tpu.dot_dimension_numbers<[1], [0], [0], [1], [0, 0, 1, 1], [], []>} : vector<16x128xbf16>, vector<128x128xbf16>, vector<16x128xf32> -> vector<16x128xf32>
    %25 = vector.extract_strided_slice %2 {offsets = [0, 640], sizes = [16, 128], strides = [1, 1]} : vector<16x768xf32> to vector<16x128xf32>
    %26 = arith.addf %25, %24 : vector<16x128xf32>
    %cst_10 = arith.constant 0.000000e+00 : f32
    %27 = vector.broadcast %cst_10 : f32 to vector<16x128xf32>
    %28 = arith.maximumf %26, %27 : vector<16x128xf32>
    %29 = tpu.concatenate %28, %28 in 1 : vector<16x128xf32>, vector<16x128xf32> -> vector<16x256xf32>
    %c0_11 = arith.constant 0 : index
    %c512 = arith.constant 512 : index
    %30 = vector.load %arg3[%c0_11, %c512] : memref<16x896xf32, #tpu.memory_space<vmem>>, vector<16x256xf32>
    %c0_12 = arith.constant 0 : index
    %c0_13 = arith.constant 0 : index
    %31 = vector.load %arg3[%c0_12, %c0_13] : memref<16x896xf32, #tpu.memory_space<vmem>>, vector<16x256xf32>
    %32 = arith.mulf %29, %31 : vector<16x256xf32>
    %c0_14 = arith.constant 0 : index
    %c256 = arith.constant 256 : index
    %33 = vector.load %arg3[%c0_14, %c256] : memref<16x896xf32, #tpu.memory_space<vmem>>, vector<16x256xf32>
    %34 = arith.mulf %30, %33 : vector<16x256xf32>
    %35 = arith.addf %32, %34 : vector<16x256xf32>
    %36 = arith.truncf %35 : vector<16x256xf32> to vector<16x256xbf16>
    %c0_15 = arith.constant 0 : index
    %c0_16 = arith.constant 0 : index
    %37 = vector.load %arg1[%c0_15, %c0_16] : memref<256x256xbf16, #tpu.memory_space<vmem>>, vector<256x128xbf16>
    %cst_17 = arith.constant dense<0.000000e+00> : vector<16x128xf32>
    %38 = tpu.matmul %36, %37, %cst_17 {dimension_numbers = #tpu.dot_dimension_numbers<[1], [0], [0], [1], [0, 0, 1, 1], [], []>} : vector<16x256xbf16>, vector<256x128xbf16>, vector<16x128xf32> -> vector<16x128xf32>
    %c0_18 = arith.constant 0 : index
    %c768 = arith.constant 768 : index
    %39 = vector.load %arg3[%c0_18, %c768] : memref<16x896xf32, #tpu.memory_space<vmem>>, vector<16x128xf32>
    %40 = arith.addf %38, %39 : vector<16x128xf32>
    %41 = arith.negf %40 : vector<16x128xf32>
    %42 = math.exp %41 : vector<16x128xf32>
    %cst_19 = arith.constant 1.000000e+00 : f32
    %43 = vector.broadcast %cst_19 : f32 to vector<16x128xf32>
    %44 = arith.addf %43, %42 : vector<16x128xf32>
    %45 = arith.divf %43, %44 : vector<16x128xf32>
    %c0_20 = arith.constant 0 : index
    %c0_21 = arith.constant 0 : index
    %46 = vector.load %arg4[%c0_20, %c0_21] : memref<16x128xf32, #tpu.memory_space<vmem>>, vector<16x128xf32>
    tpu.vector_store %arg4[%c0_20, %c0_21], %45 {strides = array<i32>} : memref<16x128xf32, #tpu.memory_space<vmem>>, vector<16x128xf32>,
    return
  }
}

</mosaic_0001>

<bundles_post_ra>
// kernel: tpu_custom_call.1
= control target key start
LH: loop header
LB: loop body
LE: loop exit
PB: predicated region body
PF: predicated region fallthrough
CT: control target
= control target key end

     0   :  { %9 = vsyncpa [#allocation3], 0  ;;  %s1440_s0 = inlined_call_operand.hbm [shape: bf16[176,768], index: 0, kind: input, shape index: {}]   ;;  %s1441_s1 = inlined_call_operand.hbm [shape: bf16[256,256], index: 1, kind: input, shape index: {}]   ;;  %s1442_s2 = inlined_call_operand.hbm [shape: bf16[16,176], index: 2, kind: input, shape index: {}]   ;;  %s1443_s3 = inlined_call_operand.hbm [shape: f32[16,896], index: 3, kind: input, shape index: {}]   ;;  %s1444_s4 = inlined_call_operand.hbm [shape: f32[16,128], index: 4, kind: output, shape index: {}]  }
   0x1   :  { %10 = vsyncpa [#allocation6], 0 }
   0x2   :  { %11 = vsyncpa [#allocation9], 0 }
   0x3   :  { %12 = vsyncpa [#allocation4], 0  ;;  %s1375_s15 = smov [#allocation5]  }
   0x4   :  { %s30_s16 = sshll.u32 %s1375_s15, 4  ;;  %s31_s16 = int_to_ptr.vmem [resolvable:$true] %s30_s16 }
   0x5   :  { %s1275_s17 = scalar_lea.vmem %s31_s16, 4096  ;;  %p1280_p1 = scmp.lt.s32.totalorder %s31_s16, %s31_s16 }
   0x6   :  { %p1276_p0 = scmp.ne.s32.totalorder %s31_s16, %s1275_s17  ;;  %p1281_p2 = scmp.lt.s32.totalorder %s1275_s17, %s1275_s17 }
   0x8   :  { %p1282_p3 = por %p1281_p2, %p1280_p1 }
   0xa   :  { %p1283_p4 = pnand %p1282_p3, %p1276_p0 }
   0xc   :  { %1286 = shalt.err (!%p1283_p4)
}
   0xd   :  { %s1376_s18 = smov 128   ;;  %s1377_s19 = smov 8  }
   0xe   :  { %36 = dma.hbm_to_vmem [thread:$0]  %s1441_s1, 4096, %s31_s16, [#allocation6], %s1376_s18, %s1376_s18, %s1377_s19  }
   0xf   :  { %s1378_s22 = smov [#allocation2]  }
  0x10   :  { %s18_s23 = sshll.u32 %s1378_s22, 4  ;;  %s19_s23 = int_to_ptr.vmem [resolvable:$true] %s18_s23 }
  0x11   :  { %s1295_s24 = scalar_lea.vmem %s19_s23, 8448  ;;  %p1300_p6 = scmp.lt.s32.totalorder %s19_s23, %s19_s23 }
  0x12   :  { %p1296_p5 = scmp.ne.s32.totalorder %s19_s23, %s1295_s24  ;;  %p1301_p7 = scmp.lt.s32.totalorder %s1295_s24, %s1295_s24 }
  0x14   :  { %p1302_p8 = por %p1301_p7, %p1300_p6 }
  0x16   :  { %p1303_p9 = pnand %p1302_p8, %p1296_p5 }
  0x18   :  { %1306 = shalt.err (!%p1303_p9)
}
  0x19   :  { %s1379_s25 = smov 384   ;;  %s1380_s26 = smov 24  }
  0x1a   :  { %24 = dma.hbm_to_vmem [thread:$0]  %s1440_s0, 8448, %s19_s23, [#allocation3], %s1379_s25, %s1379_s25, %s1380_s26  }
  0x1b   :  { %s1381_s29 = smov [#allocation7]   ;;  %s1382_s5 = smov [#allocation8]  }
  0x1c   :  { %s42_s30 = sshll.u32 %s1381_s29, 4  ;;  %s54_s1 = sshll.u32 %s1382_s5, 4  ;;  %s43_s30 = int_to_ptr.vmem [resolvable:$true] %s42_s30  ;;  %s55_s1 = int_to_ptr.vmem [resolvable:$true] %s54_s1 }
  0x1d   :  { %s1315_s6 = scalar_lea.vmem %s43_s30, 256  ;;  %p1320_p11 = scmp.lt.s32.totalorder %s43_s30, %s43_s30 }
  0x1e   :  { %p1316_p10 = scmp.ne.s32.totalorder %s43_s30, %s1315_s6  ;;  %p1321_p12 = scmp.lt.s32.totalorder %s1315_s6, %s1315_s6 }
  0x20   :  { %p1322_p13 = por %p1321_p12, %p1320_p11 }
  0x22   :  { %p1323_p0 = pnand %p1322_p13, %p1316_p10 }
  0x24   :  { %1326 = shalt.err (!%p1323_p0)
}
  0x25   :  { %48 = dma.hbm_to_vmem [thread:$0]  %s1442_s2, 256, %s43_s30, [#allocation6], %s1376_s18, %s1376_s18, %s1377_s19  }
  0x26   :  { %s1335_s0 = scalar_lea.vmem %s55_s1, 1792  ;;  %p1340_p2 = scmp.lt.s32.totalorder %s55_s1, %s55_s1 }
  0x27   :  { %p1336_p1 = scmp.ne.s32.totalorder %s55_s1, %s1335_s0  ;;  %p1341_p3 = scmp.lt.s32.totalorder %s1335_s0, %s1335_s0 }
  0x29   :  { %p1342_p4 = por %p1341_p3, %p1340_p2 }
  0x2b   :  { %p1343_p5 = pnand %p1342_p4, %p1336_p1 }
  0x2d   :  { %1346 = shalt.err (!%p1343_p5)
}
  0x2e   :  { %s1383_s9 = smov 896   ;;  %s1384_s10 = smov 56  }
  0x2f   :  { %60 = dma.hbm_to_vmem [thread:$0]  %s1443_s3, 1792, %s55_s1, [#allocation9], %s1383_s9, %s1383_s9, %s1384_s10  }
  0x30   :  { %1367 = dma.done.wait [#allocation3], 8448  }
  0x31   :  { %1368 = vsyncadd [#allocation3], 4294958848 }
  0x32   :  { %1369 = dma.done.wait [#allocation6], 4352  }
  0x33   :  { %1370 = vsyncadd [#allocation6], 4294962944 }
  0x34   :  { %1371 = dma.done.wait [#allocation9], 1792  }
  0x35   :  { %1372 = vsyncadd [#allocation9], 4294965504  ;;  %v1133_v0 = vld [vmem:[#allocation2 + $0x154] ss:$24 sps:$4 sm:$0xff]   ;;  %v1135_v1 = vld [vmem:[#allocation2 + $0x150] ss:$24 sps:$4 sm:$0xff]  }
  0x36   :  { %485 = vmatprep.subr.bf16.mxu0 %v1133_v0  ;;  %v1136_v2 = vld [vmem:[#allocation2 + $0x124] ss:$24 sps:$4 sm:$0xff]   ;;  %v1140_v4 = vld [vmem:[#allocation2 + $0x120] ss:$24 sps:$4 sm:$0xff]   ;;  %v1142_v6 = vld [vmem:[#allocation2 + $0xf4] ss:$24 sps:$4 sm:$0xff]  }
  0x37   :  { %486 = vmatpush1.bf16.msra.mxu0 %v1135_v1  ;;  %v1138_v3 = vld [vmem:[#allocation2 + $0x15c] ss:$24 sps:$4 sm:$0xff]   ;;  %v1141_v5 = vld [vmem:[#allocation2 + $0x158] ss:$24 sps:$4 sm:$0xff]   ;;  %v1144_v7 = vld [vmem:[#allocation2 + $0x12c] ss:$24 sps:$4 sm:$0xff]  }
  0x38   :  { %487 = vmatprep.subr.bf16.mxu0 %v1136_v2  ;;  %528 = vmatprep.subr.bf16.mxu1 %v1138_v3  ;;  %v1147_v8 = vld [vmem:[#allocation2 + $0x128] ss:$24 sps:$4 sm:$0xff]   ;;  %v1148_v10 = vld [vmem:[#allocation2 + $0xc4] ss:$24 sps:$4 sm:$0xff]   ;;  %v1153_v12 = vld [vmem:[#allocation2 + $0xf8] ss:$24 sps:$4 sm:$0xff]  }
  0x39   :  { %529 = vmatpush1.bf16.msra.mxu1 %v1141_v5  ;;  %v1146_v9 = vld [vmem:[#allocation2 + $0xf0] ss:$24 sps:$4 sm:$0xff]   ;;  %v1150_v11 = vld [vmem:[#allocation2 + $0xfc] ss:$24 sps:$4 sm:$0xff]   ;;  %v1152_v13 = vld [vmem:[#allocation2 + $0xc0] ss:$24 sps:$4 sm:$0xff]  }
  0x3a   :  { %530 = vmatprep.subr.bf16.mxu1 %v1144_v7  ;;  %v1156_v14 = vld [vmem:[#allocation2 + $0xcc] ss:$24 sps:$4 sm:$0xff]   ;;  %v1158_v16 = vld [vmem:[#allocation2 + $0x90] ss:$24 sps:$4 sm:$0xff]   ;;  %v1162_v18 = vld [vmem:[#allocation2 + $0x9c] ss:$24 sps:$4 sm:$0xff]  }
  0x3b   :  { %488 = vmatpush1.bf16.msra.mxu0 %v1140_v4  ;;  %v1154_v15 = vld [vmem:[#allocation2 + $0x94] ss:$24 sps:$4 sm:$0xff]   ;;  %v1159_v17 = vld [vmem:[#allocation2 + $0xc8] ss:$24 sps:$4 sm:$0xff]   ;;  %v1160_v19 = vld [vmem:[#allocation2 + $0x64] ss:$24 sps:$4 sm:$0xff]  }
  0x3c   :  { %489 = vmatprep.subr.bf16.mxu0 %v1142_v6  ;;  %v1165_v20 = vld [vmem:[#allocation2 + $0x98] ss:$24 sps:$4 sm:$0xff]   ;;  %v1168_v22 = vld [vmem:[#allocation2 + $0x6c] ss:$24 sps:$4 sm:$0xff]   ;;  %v1171_v25 = vld [vmem:[#allocation2 + $0x68] ss:$24 sps:$4 sm:$0xff]  }
  0x3d   :  { %531 = vmatpush1.bf16.msra.mxu1 %v1147_v8  ;;  %v1164_v21 = vld [vmem:[#allocation2 + $0x60] ss:$24 sps:$4 sm:$0xff]   ;;  %v1166_v23 = vld [vmem:[#allocation2 + $0x34] ss:$24 sps:$4 sm:$0xff]   ;;  %v1170_v24 = vld [vmem:[#allocation2 + $0x30] ss:$24 sps:$4 sm:$0xff]  }
  0x3e   :  { %532 = vmatprep.subr.bf16.mxu1 %v1150_v11  ;;  %v1174_v26 = vld [vmem:[#allocation2 + $0x3c] ss:$24 sps:$4 sm:$0xff]   ;;  %v1177_v28 = vld [vmem:[#allocation2 + $0x38] ss:$24 sps:$4 sm:$0xff]   ;;  %vm481_vm0 = vcmask 392192   ;;  %v1385_v5 = vmov 0.0  }
  0x3f   :  { %490 = vmatpush1.bf16.msra.mxu0 %v1146_v9  ;;  %v1172_v27 = vld [vmem:[#allocation2 + $0x4] ss:$24 sps:$4 sm:$0xff]   ;;  %v1176_v29 = vld [vmem:[#allocation2] ss:$24 sps:$4 sm:$0xff]   ;;  %v1184_v36 = vld [vmem:[#allocation2 + $0x1b4] ss:$24 sps:$4 sm:$0xff]  }
  0x40   :  { %491 = vmatprep.subr.bf16.mxu0 %v1148_v10  ;;  %v1178_v30 = vld [vmem:[#allocation2 + $0x1e4] ss:$24 sps:$4 sm:$0xff]   ;;  %v1183_v33 = vld [vmem:[#allocation2 + $0x8] ss:$24 sps:$4 sm:$0xff]   ;;  %v1195_v41 = vld [vmem:[#allocation2 + $0x1b8] ss:$24 sps:$4 sm:$0xff]  }
  0x41   :  { %533 = vmatpush1.bf16.msra.mxu1 %v1153_v12  ;;  %v1180_v31 = vld [vmem:[#allocation2 + $0xc] ss:$24 sps:$4 sm:$0xff]   ;;  %v1196_v32 = vld [vmem:[#allocation7 + $0x4] ss:$8 sps:$4 sm:$0xff]   ;;  %v1182_v34 = vld [vmem:[#allocation2 + $0x1e0] ss:$24 sps:$4 sm:$0xff]  }
  0x42   :  { %534 = vmatprep.subr.bf16.mxu1 %v1156_v14  ;;  %1040 = vmatprep.mubr.msk.bf16.mxu0 %vm481_vm0, %v1196_v32  ;;  %v1186_v35 = vld [vmem:[#allocation2 + $0x1ec] ss:$24 sps:$4 sm:$0xff]   ;;  %v1189_v37 = vld [vmem:[#allocation2 + $0x1e8] ss:$24 sps:$4 sm:$0xff]   ;;  %v1192_v39 = vld [vmem:[#allocation2 + $0x1bc] ss:$24 sps:$4 sm:$0xff]  }
  0x43   :  { %492 = vmatpush1.bf16.msra.mxu0 %v1152_v13  ;;  %1041 = vmatprep.mubr.msk.bf16.mxu1 %vm481_vm0, %v1196_v32  ;;  %v1188_v38 = vld [vmem:[#allocation2 + $0x1b0] ss:$24 sps:$4 sm:$0xff]   ;;  %v1190_v40 = vld [vmem:[#allocation2 + $0x184] ss:$24 sps:$4 sm:$0xff]   ;;  %v1194_v42 = vld [vmem:[#allocation2 + $0x180] ss:$24 sps:$4 sm:$0xff]  }
  0x44   :  { %493 = vmatprep.subr.bf16.mxu0 %v1154_v15  ;;  %v1199_v43 = vld [vmem:[#allocation2 + $0x18c] ss:$24 sps:$4 sm:$0xff]   ;;  %v1198_v45 = vld [vmem:[#allocation7] ss:$8 sps:$4 sm:$0xff]   ;;  %v1204_v46 = vld [vmem:[#allocation2 + $0x188] ss:$24 sps:$4 sm:$0xff]  }
  0x45   :  { %535 = vmatpush1.bf16.msra.mxu1 %v1159_v17  ;;  %v1203_v44 = vld [vmem:[#allocation2 + $0x164] ss:$24 sps:$4 sm:$0xff]   ;;  %v1201_v47 = vld [vmem:[#allocation2 + $0x160] ss:$24 sps:$4 sm:$0xff]   ;;  %v1207_v48 = vld [vmem:[#allocation2 + $0x134] ss:$24 sps:$4 sm:$0xff]  }
  0x46   :  { %536 = vmatprep.subr.bf16.mxu1 %v1162_v18  ;;  %v1205_v49 = vld [vmem:[#allocation2 + $0x130] ss:$24 sps:$4 sm:$0xff]   ;;  %v1210_v50 = vld [vmem:[#allocation2 + $0x104] ss:$24 sps:$4 sm:$0xff]   ;;  %v1208_v51 = vld [vmem:[#allocation2 + $0x100] ss:$24 sps:$4 sm:$0xff]  }
  0x47   :  { %494 = vmatpush1.bf16.msra.mxu0 %v1158_v16  ;;  %v1213_v52 = vld [vmem:[#allocation2 + $0xd4] ss:$24 sps:$4 sm:$0xff]   ;;  %v1211_v53 = vld [vmem:[#allocation2 + $0xd0] ss:$24 sps:$4 sm:$0xff]   ;;  %v1216_v54 = vld [vmem:[#allocation2 + $0xa4] ss:$24 sps:$4 sm:$0xff]  }
  0x48   :  { %495 = vmatprep.subr.bf16.mxu0 %v1160_v19  ;;  %v1214_v55 = vld [vmem:[#allocation2 + $0xa0] ss:$24 sps:$4 sm:$0xff]   ;;  %v1219_v56 = vld [vmem:[#allocation2 + $0x74] ss:$24 sps:$4 sm:$0xff]   ;;  %v1217_v57 = vld [vmem:[#allocation2 + $0x70] ss:$24 sps:$4 sm:$0xff]  }
  0x49   :  { %537 = vmatpush1.bf16.msra.mxu1 %v1165_v20  ;;  %v1222_v58 = vld [vmem:[#allocation2 + $0x44] ss:$24 sps:$4 sm:$0xff]   ;;  %v1220_v59 = vld [vmem:[#allocation2 + $0x40] ss:$24 sps:$4 sm:$0xff]   ;;  %v1225_v60 = vld [vmem:[#allocation2 + $0x14] ss:$24 sps:$4 sm:$0xff]  }
  0x4a   :  { %538 = vmatprep.subr.bf16.mxu1 %v1168_v22  ;;  %v1223_v61 = vld [vmem:[#allocation2 + $0x10] ss:$24 sps:$4 sm:$0xff]   ;;  %v1228_v62 = vld [vmem:[#allocation2 + $0x1f4] ss:$24 sps:$4 sm:$0xff]   ;;  %v1231_v0 = vld [vmem:[#allocation2 + $0x1c4] ss:$24 sps:$4 sm:$0xff]  }
  0x4b   :  { %496 = vmatpush1.bf16.msra.mxu0 %v1164_v21  ;;  %v1226_v63 = vld [vmem:[#allocation2 + $0x1f0] ss:$24 sps:$4 sm:$0xff]   ;;  %v1229_v1 = vld [vmem:[#allocation2 + $0x1c0] ss:$24 sps:$4 sm:$0xff]   ;;  %v1234_v2 = vld [vmem:[#allocation2 + $0x194] ss:$24 sps:$4 sm:$0xff]  }
  0x4c   :  { %497 = vmatprep.subr.bf16.mxu0 %v1166_v23  ;;  %v1232_v3 = vld [vmem:[#allocation2 + $0x190] ss:$24 sps:$4 sm:$0xff]   ;;  %v1235_v4 = vld [vmem:[#allocation5 + $0x74] ss:$8 sps:$4 sm:$0xff]   ;;  %v1236_v6 = vld [vmem:[#allocation5 + $0x64] ss:$8 sps:$4 sm:$0xff]  }
  0x4d   :  { %539 = vmatpush1.bf16.msra.mxu1 %v1171_v25  ;;  %v1237_v7 = vld [vmem:[#allocation5 + $0x54] ss:$8 sps:$4 sm:$0xff]   ;;  %v1238_v8 = vld [vmem:[#allocation5 + $0x44] ss:$8 sps:$4 sm:$0xff]   ;;  %vm1386_vm1 = vmmov 0   ;;  %s1387_s2 = smov [#allocation10]  }
  0x4e   :  { %540 = vmatprep.subr.bf16.mxu1 %v1174_v26  ;;  %v1239_v9 = vld [vmem:[#allocation5 + $0x34] ss:$8 sps:$4 sm:$0xff]   ;;  %v1240_v10 = vld [vmem:[#allocation5 + $0x24] ss:$8 sps:$4 sm:$0xff]   ;;  %v1243_v13 = vld [vmem:[#allocation5 + $0xf0] ss:$8 sps:$4 sm:$0xff]  }
  0x4f   :  { %498 = vmatpush1.bf16.msra.mxu0 %v1170_v24  ;;  %v1241_v11 = vld [vmem:[#allocation5 + $0x14] ss:$8 sps:$4 sm:$0xff]   ;;  %v1242_v12 = vld [vmem:[#allocation5 + $0x4] ss:$8 sps:$4 sm:$0xff]   ;;  %s958_s3 = sshll.u32 %s1387_s2, 4  ;;  %s959_s3 = int_to_ptr.vmem [resolvable:$true] %s958_s3 }
  0x50   :  { %499 = vmatprep.subr.bf16.mxu0 %v1172_v27  ;;  %s1347_s13 = scalar_lea.vmem %s959_s3, 256  ;;  %p1352_p7 = scmp.lt.s32.totalorder %s959_s3, %s959_s3 }
  0x51   :  { %541 = vmatpush1.bf16.msra.mxu1 %v1177_v28  ;;  %p1348_p6 = scmp.ne.s32.totalorder %s959_s3, %s1347_s13  ;;  %p1353_p8 = scmp.lt.s32.totalorder %s1347_s13, %s1347_s13 }
  0x52   :  { %542 = vmatprep.subr.bf16.mxu1 %v1180_v31 }
  0x53   :  { %500 = vmatpush1.bf16.msra.mxu0 %v1176_v29  ;;  %p1354_p9 = por %p1353_p8, %p1352_p7 }
  0x54   :  { %511 = vmatprep.subr.bf16.mxu0 %v1178_v30 }
  0x55   :  { %543 = vmatpush1.bf16.msra.mxu1 %v1183_v33  ;;  %p1355_p10 = pnand %p1354_p9, %p1348_p6 }
  0x56   :  { %554 = vmatprep.subr.bf16.mxu1 %v1186_v35 }
  0x57   :  { %512 = vmatpush2.bf16.msra.mxu0 %v1182_v34 }
  0x58   :  { %513 = vmatprep.subr.bf16.mxu0 %v1184_v36 }
  0x59   :  { %555 = vmatpush2.bf16.msra.mxu1 %v1189_v37 }
  0x5a   :  { %556 = vmatprep.subr.bf16.mxu1 %v1192_v39 }
  0x5b   :  { %514 = vmatpush2.bf16.msra.mxu0 %v1188_v38 }
  0x5c   :  { %515 = vmatprep.subr.bf16.mxu0 %v1190_v40 }
  0x5d   :  { %557 = vmatpush2.bf16.msra.mxu1 %v1195_v41 }
  0x5e   :  { %558 = vmatprep.subr.bf16.mxu1 %v1199_v43  ;;  %v1244_v43 = vld [vmem:[#allocation5 + $0x70] ss:$8 sps:$4 sm:$0xff]  }
  0x5f   :  { %516 = vmatpush2.bf16.msra.mxu0 %v1194_v42 }
  0x60   :  { %571 = vmatprep.subr.bf16.mxu0 %v1203_v44 }
  0x61   :  { %559 = vmatpush2.bf16.msra.mxu1 %v1204_v46  ;;  %v1246_v46 = vld [vmem:[#allocation5 + $0x60] ss:$8 sps:$4 sm:$0xff]  }
  0x62   :  { %518 = vmatmul.mubr.bf16.vlgmr.msra.gmra.mxu0 %v1198_v45  ;;  %1100 = vmatprep.subr.bf16.mxu1 %v1385_v5 }
  0x63   :  { %572 = vmatpush1.bf16.msra.mxu0 %v1201_v47  ;;  %1042 = vmatprep.mubr.msk.bf16.mxu0 %vm481_vm0, %v1196_v32  ;;  %v1247_v47 = vld [vmem:[#allocation5 + $0xd0] ss:$8 sps:$4 sm:$0xff]  }
  0x64   :  { %573 = vmatprep.subr.bf16.mxu0 %v1207_v48  ;;  %561 = vmatmul.mubr.bf16.vlgmr.msra.gmra.mxu1 %v1198_v45  ;;  %v1248_v48 = vld [vmem:[#allocation5 + $0x50] ss:$8 sps:$4 sm:$0xff]  }
  0x65   :  { %1101 = vmatpush3.bf16.msra.mxu1 %v1235_v4  ;;  %1116 = vmatprep.mubr.msk.bf16.mxu1 %vm1386_vm1, %v1385_v5  ;;  %v744_v4 = vld [vmem:[#allocation8 + $0x58] sm:$0xff] }
  0x66   :  { %1102 = vmatprep.subr.bf16.mxu1 %v1385_v5 }
  0x67   :  { %574 = vmatpush1.bf16.msra.mxu0 %v1205_v49  ;;  %v1249_v49 = vld [vmem:[#allocation5 + $0xc0] ss:$8 sps:$4 sm:$0xff]  }
  0x68   :  { %575 = vmatprep.subr.bf16.mxu0 %v1210_v50  ;;  %v1250_v50 = vld [vmem:[#allocation5 + $0x40] ss:$8 sps:$4 sm:$0xff]  }
  0x69   :  { %1103 = vmatpush3.bf16.msra.mxu1 %v1236_v6 }
  0x6a   :  { %1104 = vmatprep.subr.bf16.mxu1 %v1385_v5 }
  0x6b   :  { %576 = vmatpush1.bf16.msra.mxu0 %v1208_v51  ;;  %v1251_v51 = vld [vmem:[#allocation5 + $0xb0] ss:$8 sps:$4 sm:$0xff]  }
  0x6c   :  { %577 = vmatprep.subr.bf16.mxu0 %v1213_v52  ;;  %v1252_v52 = vld [vmem:[#allocation5 + $0x30] ss:$8 sps:$4 sm:$0xff]  }
  0x6d   :  { %1105 = vmatpush3.bf16.msra.mxu1 %v1237_v7  ;;  %v747_v7 = vld [vmem:[#allocation8 + $0x8] sm:$0xff] }
  0x6e   :  { %1106 = vmatprep.subr.bf16.mxu1 %v1385_v5 }
  0x6f   :  { %578 = vmatpush1.bf16.msra.mxu0 %v1211_v53  ;;  %v1253_v53 = vld [vmem:[#allocation5 + $0xa0] ss:$8 sps:$4 sm:$0xff]  }
  0x70   :  { %579 = vmatprep.subr.bf16.mxu0 %v1216_v54  ;;  %v1254_v54 = vld [vmem:[#allocation5 + $0x20] ss:$8 sps:$4 sm:$0xff]  }
  0x71   :  { %1107 = vmatpush3.bf16.msra.mxu1 %v1238_v8 }
  0x72   :  { %1108 = vmatprep.subr.bf16.mxu1 %v1385_v5 }
  0x73   :  { %580 = vmatpush1.bf16.msra.mxu0 %v1214_v55  ;;  %v1255_v55 = vld [vmem:[#allocation5 + $0x90] ss:$8 sps:$4 sm:$0xff]  }
  0x74   :  { %581 = vmatprep.subr.bf16.mxu0 %v1219_v56  ;;  %v1256_v56 = vld [vmem:[#allocation5 + $0x10] ss:$8 sps:$4 sm:$0xff]  }
  0x75   :  { %1109 = vmatpush3.bf16.msra.mxu1 %v1239_v9  ;;  %v745_v9 = vld [vmem:[#allocation8 + $0x60] sm:$0xff] }
  0x76   :  { %1110 = vmatprep.subr.bf16.mxu1 %v1385_v5 }
  0x77   :  { %582 = vmatpush1.bf16.msra.mxu0 %v1217_v57  ;;  %v1257_v57 = vld [vmem:[#allocation5 + $0x80] ss:$8 sps:$4 sm:$0xff]  }
  0x78   :  { %583 = vmatprep.subr.bf16.mxu0 %v1222_v58  ;;  %v1258_v58 = vld [vmem:[#allocation5] ss:$8 sps:$4 sm:$0xff]  }
  0x79   :  { %1111 = vmatpush3.bf16.msra.mxu1 %v1240_v10  ;;  %v757_v10 = vld [vmem:[#allocation8 + $0x50] sm:$0xff] }
  0x7a   :  { %1112 = vmatprep.subr.bf16.mxu1 %v1385_v5 }
  0x7b   :  { %584 = vmatpush1.bf16.msra.mxu0 %v1220_v59 }
  0x7c   :  { %585 = vmatprep.subr.bf16.mxu0 %v1225_v60 }
  0x7d   :  { %1113 = vmatpush3.bf16.msra.mxu1 %v1241_v11 }
  0x7e   :  { %1114 = vmatprep.subr.bf16.mxu1 %v1385_v5  ;;  %v756_v5 = vld [vmem:[#allocation8 + $0x48] sm:$0xff] }
  0x7f   :  { %586 = vmatpush1.bf16.msra.mxu0 %v1223_v61  ;;  %v742_v61 = vld [vmem:[#allocation8 + $0x20] sm:$0xff] }
  0x80   :  { %597 = vmatprep.subr.bf16.mxu0 %v1228_v62  ;;  %v743_v62 = vld [vmem:[#allocation8 + $0x28] sm:$0xff] }
  0x81   :  { %1115 = vmatpush3.bf16.msra.mxu1 %v1242_v12 }
  0x82   :  { %1078 = vmatprep.subr.bf16.mxu1 %v1243_v13 }
  0x83   :  { %598 = vmatpush2.bf16.msra.mxu0 %v1226_v63  ;;  %v746_v63 = vld [vmem:[#allocation8] sm:$0xff] }
  0x84   :  { %599 = vmatprep.subr.bf16.mxu0 %v1231_v0  ;;  %v754_v0 = vld [vmem:[#allocation8 + $0x10] sm:$0xff] }
  0x85   :  { %v758_v12 = vmul.f32 %v754_v0, %v742_v61 }
  0x87   :  { %600 = vmatpush2.bf16.msra.mxu0 %v1229_v1 }
  0x88   :  { %601 = vmatprep.subr.bf16.mxu0 %v1234_v2 }
  0x8b   :  { %602 = vmatpush2.bf16.msra.mxu0 %v1232_v3  ;;  %v755_v3 = vld [vmem:[#allocation8 + $0x18] sm:$0xff] }
  0x8c   :  { %v759_v13 = vmul.f32 %v755_v3, %v743_v62 }
  0x8e   :  { %604 = vmatmul.mubr.bf16.vlgmr.msra.gmra.mxu0 %v1198_v45  ;;  %v1245_v45 = vld [vmem:[#allocation5 + $0xe0] ss:$8 sps:$4 sm:$0xff]  }
 0x122   :  { %v519_v14 = vpop.f32.mrf.mxu0 }
 0x123   :  { %v614_v20 = vmax.f32 %v519_v14, 0.0  ;;  %v748_v14 = vld [vmem:[#allocation8 + $0x38] sm:$0xff] }
 0x124   :  { %v521_v15 = vpop.f32.mrf.mxu0  ;;  %v562_v17 = vpop.f32.mrf.mxu1 }
 0x125   :  { %v616_v21 = vmax.f32 %v521_v15, 0.0  ;;  %v620_v26 = vmax.f32 %v562_v17, 0.0  ;;  %v749_v15 = vld [vmem:[#allocation8 + $0x40] sm:$0xff] }
 0x126   :  { %v523_v16 = vpop.f32.mrf.mxu0  ;;  %v564_v19 = vpop.f32.mrf.mxu1 }
 0x127   :  { %v615_v24 = vmax.f32 %v523_v16, 0.0  ;;  %v618_v25 = vmax.f32 %v614_v20, %v616_v21  ;;  %v624_v32 = vmax.f32 %v564_v19, 0.0  ;;  %v760_v16 = vmul.f32 %v756_v5, %v744_v4 }
 0x128   :  { %v525_v18 = vpop.f32.mrf.mxu0  ;;  %v566_v23 = vpop.f32.mrf.mxu1  ;;  %v761_v21 = vmul.f32 %v757_v10, %v745_v9 }
 0x129   :  { %v617_v22 = vmax.f32 %v525_v18, 0.0  ;;  %v621_v28 = vmax.f32 %v566_v23, 0.0  ;;  %v622_v31 = vmax.f32 %v618_v25, %v620_v26 }
 0x12a   :  { %v568_v29 = vpop.f32.mrf.mxu1 }
 0x12b   :  { %v619_v27 = vmax.f32 %v615_v24, %v617_v22  ;;  %v625_v34 = vmax.f32 %v568_v29, 0.0  ;;  %v626_v38 = vmax.f32 %v622_v31, %v624_v32  ;;  %v800_v31 = vld [vmem:[#allocation8 + $0x30] sm:$0xff] }
 0x12d   :  { %v623_v33 = vmax.f32 %v619_v27, %v621_v28 }
 0x12f   :  { %v627_v39 = vmax.f32 %v623_v33, %v625_v34 }
 0x14e   :  { %v605_v30 = vpop.f32.mrf.mxu0 }
 0x14f   :  { %v628_v36 = vmax.f32 %v605_v30, 0.0 }
 0x150   :  { %v607_v35 = vpop.f32.mrf.mxu0 }
 0x151   :  { %v630_v41 = vmax.f32 %v626_v38, %v628_v36  ;;  %v801_v36 = vld [vmem:[#allocation8 + $0x68] sm:$0xff] }
 0x152   :  { %v609_v37 = vpop.f32.mrf.mxu0 }
 0x153   :  { %v629_v40 = vmax.f32 %v609_v37, 0.0 }
 0x154   :  { %v611_v6 = vpop.f32.mrf.mxu0 }
 0x155   :  { %v631_v42 = vmax.f32 %v627_v39, %v629_v40 }
 0x157   :  { %v632_v44 = vpack.c.bf16 %v631_v42, %v630_v41 }
 0x159   :  { %1117 = vmatmul.mubr.bf16.vlgmr.msra.gmra.mxu1 %v632_v44 }
 0x15a   :  { %1079 = vmatpush3.bf16.msra.mxu1 %v1244_v43 }
 0x15b   :  { %1080 = vmatprep.subr.bf16.mxu1 %v1245_v45 }
 0x15e   :  { %1081 = vmatpush3.bf16.msra.mxu1 %v1246_v46 }
 0x15f   :  { %1082 = vmatprep.subr.bf16.mxu1 %v1247_v47 }
 0x162   :  { %1083 = vmatpush3.bf16.msra.mxu1 %v1248_v48 }
 0x163   :  { %1084 = vmatprep.subr.bf16.mxu1 %v1249_v49 }
 0x166   :  { %1085 = vmatpush3.bf16.msra.mxu1 %v1250_v50 }
 0x167   :  { %1086 = vmatprep.subr.bf16.mxu1 %v1251_v51 }
 0x16a   :  { %1087 = vmatpush3.bf16.msra.mxu1 %v1252_v52 }
 0x16b   :  { %1088 = vmatprep.subr.bf16.mxu1 %v1253_v53 }
 0x16e   :  { %1089 = vmatpush3.bf16.msra.mxu1 %v1254_v54 }
 0x16f   :  { %1090 = vmatprep.subr.bf16.mxu1 %v1255_v55 }
 0x172   :  { %1091 = vmatpush3.bf16.msra.mxu1 %v1256_v56 }
 0x173   :  { %1092 = vmatprep.subr.bf16.mxu1 %v1257_v57 }
 0x176   :  { %1093 = vmatpush3.bf16.msra.mxu1 %v1258_v58 }
 0x219   :  { %v731_v59 = vpop.f32.mrf.mxu1 }
 0x21a   :  { %v738_v60 = vadd.f32 %v731_v59, %v607_v35 }
 0x21b   :  { %v1118_v1 = vpop.f32.mrf.mxu1 }
 0x21c   :  { %v740_v2 = vmax.f32 %v738_v60, 0.0 }
 0x21d   :  { %v734_v8 = vpop.f32.mrf.mxu1 }
 0x21e   :  { %v739_v11 = vadd.f32 %v734_v8, %v611_v6  ;;  %v750_v18 = vmul.f32 %v746_v63, %v740_v2  ;;  %v751_v19 = vmul.f32 %v747_v7, %v740_v2 }
 0x21f   :  { %v1119_v17 = vpop.f32.mrf.mxu1 }
 0x220   :  { %v741_v20 = vmax.f32 %v739_v11, 0.0  ;;  %v762_v24 = vadd.f32 %v758_v12, %v750_v18  ;;  %v763_v25 = vadd.f32 %v759_v13, %v751_v19 }
 0x222   :  { %v752_v22 = vmul.f32 %v748_v14, %v741_v20  ;;  %v753_v23 = vmul.f32 %v749_v15, %v741_v20 }
 0x224   :  { %v764_v26 = vadd.f32 %v760_v16, %v752_v22  ;;  %v765_v27 = vadd.f32 %v761_v21, %v753_v23 }
 0x226   :  { %v766_v28 = vpack.c.bf16 %v764_v26, %v762_v24  ;;  %v767_v29 = vpack.c.bf16 %v765_v27, %v763_v25 }
 0x228   :  { %930 = vmatprep.mubr.bf16.mxu1 %v767_v29 }
 0x229   :  { %931 = vmatmul.mubr.bf16.vlgmr.msra.gmra.mxu1 %v766_v28 }
 0x2e9   :  { %v1094_v30 = vpop.f32.mrf.mxu1 }
 0x2eb   :  { %v1095_v32 = vpop.f32.mrf.mxu1 }
 0x2ec   :  { %v1096_v33 = vadd.f32 %v1095_v32, %v1094_v30 }
 0x2ed   :  { %v1097_v34 = vpop.f32.mrf.mxu1 }
 0x2ee   :  { %v933_v35 = vadd.f32 %v1096_v33, %v800_v31 }
 0x2ef   :  { %v1098_v37 = vpop.f32.mrf.mxu1 }
 0x2f0   :  { %v1067_v38 = vmul.f32 -1.442695, %v933_v35  ;;  %v1099_v39 = vadd.f32 %v1098_v37, %v1097_v34 }
 0x2f2   :  { %1259 = vpow2.f32 %v1067_v38  ;;  %v936_v40 = vadd.f32 %v1099_v39, %v801_v36 }
 0x2f4   :  { %v1068_v41 = vmul.f32 -1.442695, %v936_v40 }
 0x2f6   :  { %1261 = vpow2.f32 %v1068_v41 }
 0x2ff   :  { %v1260_v42 = vpop.eup %1259 }
 0x300   :  { %v945_v43 = vadd.f32 1.0, %v1260_v42 }
 0x302   :  { %1263 = vrcp.f32 %v945_v43 }
 0x303   :  { %v1262_v44 = vpop.eup %1261 }
 0x304   :  { %v946_v45 = vadd.f32 1.0, %v1262_v44 }
 0x306   :  { %1265 = vrcp.f32 %v946_v45 }
 0x30f   :  { %v1264_v46 = vpop.eup %1263 }
 0x310   :  { %951 = vst [vmem:[#allocation10] sm:$0xff] %v1264_v46 }
 0x313   :  { %v1266_v47 = vpop.eup %1265 }
 0x314   :  { %952 = vst [vmem:[#allocation10 + $0x8] sm:$0xff] %v1266_v47 }
 0x315   :  { %1358 = shalt.err (!%p1355_p10)
}
 0x316   :  { %964 = dma.vmem_to_hbm [thread:$0]  %s959_s3, 256, %s1444_s4, [#allocation4], %s1376_s18, %s1376_s18, %s1377_s19  }
 0x317   :  { %1373 = dma.done.wait [#allocation4], 256  }
 0x318   :  { %1374 = vsyncadd [#allocation4], 4294967040 }
 0x319   :  { %968 = vsyncpa [#allocation3], 1 }
 0x31a   :  { %969 = vsyncpa [#allocation6], 1 }
 0x31b   :  { %970 = vsyncpa [#allocation9], 1 }
 0x31c   :  { %971 = vsyncpa [#allocation4], 1 }

</bundles_post_ra>
